<compile_context>
chip_gen: v5e
topology: v5e:2x2
jax: 0.10.0
libtpu: 0.0.40
codegen_flags: <defaults>
</compile_context>

<pallas_src>
import functools

import numpy as np

import jax
import jax.numpy as jnp
from jax.experimental import pallas as pl
from jax.experimental.pallas import tpu as pltpu


def _cdiv(a, b):
    return -(-a // b)


def _round_up(x, m):
    return _cdiv(x, m) * m


def _anchor_kernel(const_ref, out_ref, *, tile_r):
    """const_ref: (2, L) f32 [row_scale; lane_base]; out_ref: (tile_r, L) f32."""
    # Global feature-map row index for each local row of this tile: (tile_r, 1).
    row = (jax.lax.broadcasted_iota(jnp.int32, (tile_r, 1), 0)
           + pl.program_id(0) * tile_r)
    # int32 -> f32 cast is exact for f_h < 2**24 (always true for feature maps).
    y = row.astype(jnp.float32)
    # (tile_r, 1) * (1, L) + (1, L) -> (tile_r, L); one vmul + one vadd per element.
    out_ref[...] = y * const_ref[0:1, :] + const_ref[1:2, :]


def generate_cell_anchors(sizes, aspect_ratios):
    """Equivalent of AnchorGenerator.generate_anchors (torch semantics), in numpy."""
    sizes = np.asarray(sizes, dtype=np.float32)
    ar = np.asarray(aspect_ratios, dtype=np.float32)
    h_ratios = np.sqrt(ar)
    w_ratios = 1.0 / h_ratios
    ws = (w_ratios[:, None] * sizes[None, :]).reshape(-1)
    hs = (h_ratios[:, None] * sizes[None, :]).reshape(-1)
    base = np.stack([-ws, -hs, ws, hs], axis=1) / 2.0
    # np.round is round-half-to-even, same as torch.round.
    return np.round(base).astype(np.float32)          # (A, 4)


class AnchorGenerator:
    def __init__(self, sizes, aspect_ratios, batch_size_per_image, positive_fraction):
        self.sizes = sizes
        self.aspect_ratios = aspect_ratios
        # TODO(synk): BalancedPositiveNegativeSampler is constructed in __init__ but
        # never used in forward; omitted here.
        self._cache = {}

    def __call__(self, batch_imgs, feature_maps):
        # TODO(synk): multi-feature-map (FPN) path in the torch reference is
        # self-inconsistent (adds a python list to a tensor); single level only.
        fm = feature_maps[0]
        f_h, f_w = int(fm.shape[-2]), int(fm.shape[-1])
        pad_h, pad_w = int(batch_imgs.shape[-2]), int(batch_imgs.shape[-1])
        stride_h, stride_w = pad_h // f_h, pad_w // f_w

        cache_key = (f_h, f_w, stride_h, stride_w, self.sizes, self.aspect_ratios)
        if cache_key in self._cache:
            return self._cache[cache_key]

        # Compile-time cell anchors (sizes / aspect_ratios are static tuples).
        cell = np.concatenate(
            [generate_cell_anchors(s, a) for s, a in zip(self.sizes, self.aspect_ratios)],
            axis=0,
        )  # (A, 4) f32
        A = int(cell.shape[0])

        # Lane-dense, *unpadded* layout: slab row y holds lanes l = (x*A + a)*4 + c;
        # out[y, l] = y * row_scale[l] + lane_base[l], matching the torch layout
        # (shifts.view(-1,1,4) + cell.view(1,-1,4)).reshape(-1,4) after a free reshape.
        lane_w = f_w * A * 4
        lidx = np.arange(lane_w)
        x_cell = (lidx // (A * 4)).astype(np.float32)        # grid x per lane
        is_x = ((lidx % 2) == 0).astype(np.float32)          # coords 0, 2
        is_y = ((lidx % 2) == 1).astype(np.float32)          # coords 1, 3
        cell_tiled = np.tile(cell.reshape(-1), f_w)
        row_scale = is_y * float(stride_h)                   # y shift per row
        lane_base = is_x * x_cell * float(stride_w) + cell_tiled
        consts = jnp.asarray(np.stack([row_scale, lane_base], axis=0))   # (2, lane_w)

        # ---- row tiling: no lane padding; avoid row padding whenever possible ----
        row_bytes = lane_w * 4
        block_budget = 4 * 1024 * 1024   # per output block; double-buffered -> 8 MiB
        rows_fit = max(8, (block_budget // row_bytes) // 8 * 8)

        if f_h % 8 == 0:
            # Multiple-of-8 divisors of f_h -> zero row padding, full-width stores.
            divisors = [t for t in range(8, f_h + 1, 8) if f_h % t == 0]
            fit = [t for t in divisors if t <= rows_fit] or [8]
            # Prefer >= 2 grid steps so the "parallel" axis feeds both v7x cores.
            multi = [t for t in fit if f_h // t >= 2]
            tile_r = max(multi) if multi else max(fit)
            h_pad = f_h
        elif f_h * row_bytes <= block_budget:
            # One full-extent block (block row dim == array dim is always legal).
            tile_r, h_pad = f_h, f_h
        else:
            # Fallback: balanced row tiles with minimal tail padding; the wrapper
            # then does a contiguous prefix slice (cheap) instead of a strided one.
            n_tiles = _cdiv(f_h, rows_fit)
            tile_r = _round_up(_cdiv(f_h, n_tiles), 8)
            h_pad = n_tiles * tile_r

        grid = (h_pad // tile_r,)
        block_bytes = tile_r * row_bytes
        const_bytes = 2 * lane_w * 4
        vmem_need = 2 * block_bytes + 2 * const_bytes          # double-buffered
        if vmem_need > 30 * 1024 * 1024:
            # TODO(synk): add a second (lane) grid axis for pathologically wide maps.
            raise NotImplementedError("feature map too wide for single-axis row tiling")
        vmem_limit = int(min(32 * 1024 * 1024, max(16 * 1024 * 1024, 2 * vmem_need)))

        kernel = functools.partial(_anchor_kernel, tile_r=tile_r)
        out = pl.pallas_call(
            kernel,
            out_shape=jax.ShapeDtypeStruct((h_pad, lane_w), jnp.float32),
            grid=grid,
            in_specs=[pl.BlockSpec((2, lane_w), lambda i: (0, 0))],
            out_specs=pl.BlockSpec((tile_r, lane_w), lambda i: (i, 0)),
            compiler_params=pltpu.CompilerParams(
                dimension_semantics=("parallel",),
                vmem_limit_bytes=vmem_limit),
            cost_estimate=pl.CostEstimate(
                flops=2 * h_pad * lane_w,
                transcendentals=0,
                bytes_accessed=h_pad * lane_w * 4 + const_bytes),
        )(consts)

        # Free contiguous reshape to the torch layout (H*W*A, 4); a contiguous prefix
        # slice is only needed in the (rare) row-padded fallback.
        slab = out if h_pad == f_h else out[:f_h]
        anchors = slab.reshape(f_h * f_w * A, 4)
        self._cache[cache_key] = anchors
        return anchors


def _reference(batch_imgs, feature_maps, sizes, aspect_ratios):
    """Plain-JAX reference matching the torch semantics (single level)."""
    fm = feature_maps[0]
    f_h, f_w = int(fm.shape[-2]), int(fm.shape[-1])
    pad_h, pad_w = int(batch_imgs.shape[-2]), int(batch_imgs.shape[-1])
    s_h, s_w = pad_h // f_h, pad_w // f_w
    hs = jnp.arange(f_h) * s_h
    ws = jnp.arange(f_w) * s_w
    shift_y, shift_x = jnp.meshgrid(hs, ws, indexing="ij")
    shift_y = shift_y.reshape(-1)
    shift_x = shift_x.reshape(-1)
    shifts = jnp.stack([shift_x, shift_y, shift_x, shift_y], axis=1).astype(jnp.float32)
    cell = jnp.asarray(np.concatenate(
        [generate_cell_anchors(s, a) for s, a in zip(sizes, aspect_ratios)], axis=0))
    anchors = shifts.reshape(-1, 1, 4) + cell.reshape(1, -1, 4)
    return anchors.reshape(-1, 4)


if __name__ == "__main__":
    key = jax.random.PRNGKey(0)
    k1, k2 = jax.random.split(key)

    # small, module-consistent shapes:
    #   padded images (NCHW): (2, 3, 32, 32); one feature map (NCHW): (2, 4, 8, 8)
    batch_imgs = jax.random.normal(k1, (2, 3, 32, 32), dtype=jnp.float32)
    feature_map = jax.random.normal(k2, (2, 4, 8, 8), dtype=jnp.float32)

    sizes = ((32, 64, 128),)
    aspect_ratios = ((0.5, 1.0, 2.0),)
    gen = AnchorGenerator(sizes, aspect_ratios, batch_size_per_image=256, positive_fraction=0.5)

    anchors = gen(batch_imgs, [feature_map])
    anchors = jax.block_until_ready(anchors)

    ref = jax.block_until_ready(_reference(batch_imgs, [feature_map], sizes, aspect_ratios))
    assert anchors.shape == (8 * 8 * 9, 4), anchors.shape
    assert jnp.allclose(anchors, ref), "mismatch vs reference"

    print("KERNEL_OK")
</pallas_src>

<mosaic_0001>
module attributes {stable_mosaic.version = 11 : i64} {
  func.func @_anchor_kernel(%arg0: i32, %arg1: memref<2x288xf32, #tpu.memory_space<vmem>>, %arg2: memref<8x288xf32, #tpu.memory_space<vmem>>) attributes {dimension_semantics = [#tpu.dimension_semantics<parallel>], iteration_bounds = array<i64: 1>, scalar_prefetch = 0 : i64, scratch_operands = 0 : i64, tpu.core_type = #tpu.core_type<tc>, window_params = [{pipeline_mode = #tpu.pipeline_mode<synchronous>, transform_indices = @transform_0, window_bounds = array<i64: 2, 288>}, {transform_indices = @transform_1, window_bounds = array<i64: 8, 288>}]} {
    %0 = tpu.iota {dimensions = array<i32: 0>} : vector<8x1xi32>
    %c8_i32 = arith.constant 8 : i32
    %1 = arith.muli %arg0, %c8_i32 : i32
    %2 = vector.broadcast %1 : i32 to vector<8x1xi32>
    %3 = arith.addi %0, %2 : vector<8x1xi32>
    %4 = arith.sitofp %3 : vector<8x1xi32> to vector<8x1xf32>
    %c0 = arith.constant 0 : index
    %c0_0 = arith.constant 0 : index
    %5 = vector.load %arg1[%c0, %c0_0] : memref<2x288xf32, #tpu.memory_space<vmem>>, vector<1x288xf32>
    %6 = vector.broadcast %4 : vector<8x1xf32> to vector<8x288xf32>
    %7 = vector.broadcast %5 : vector<1x288xf32> to vector<8x288xf32>
    %8 = arith.mulf %6, %7 : vector<8x288xf32>
    %c1 = arith.constant 1 : index
    %c0_1 = arith.constant 0 : index
    %9 = vector.load %arg1[%c1, %c0_1] : memref<2x288xf32, #tpu.memory_space<vmem>>, vector<1x288xf32>
    %10 = vector.broadcast %9 : vector<1x288xf32> to vector<8x288xf32>
    %11 = arith.addf %8, %10 : vector<8x288xf32>
    %c0_2 = arith.constant 0 : index
    %c0_3 = arith.constant 0 : index
    %12 = vector.load %arg2[%c0_2, %c0_3] : memref<8x288xf32, #tpu.memory_space<vmem>>, vector<8x288xf32>
    tpu.vector_store %arg2[%c0_2, %c0_3], %11 {strides = array<i32>} : memref<8x288xf32, #tpu.memory_space<vmem>>, vector<8x288xf32>,
    return
  }
  func.func @transform_0(%arg0: i32) -> (i32, i32) {
    %c0_i32 = arith.constant 0 : i32
    %c0_i32_0 = arith.constant 0 : i32
    %c0_i32_1 = arith.constant 0 : i32
    return %c0_i32, %c0_i32_0 : i32, i32
  }
  func.func @transform_1(%arg0: i32) -> (i32, i32) {
    %c0_i32 = arith.constant 0 : i32
    %c0_i32_0 = arith.constant 0 : i32
    return %arg0, %c0_i32 : i32, i32
  }
}

</mosaic_0001>

<bundles_post_ra>
// kernel: tpu_custom_call.1
= control target key start
LH: loop header
LB: loop body
LE: loop exit
PB: predicated region body
PF: predicated region fallthrough
CT: control target
= control target key end

     0   :  { %6 = vsyncpa [#allocation3], 0  ;;  %s145_s0 = inlined_call_operand.hbm [shape: f32[2,288], index: 0, kind: input, shape index: {}]   ;;  %s146_s1 = inlined_call_operand.hbm [shape: f32[8,288], index: 1, kind: output, shape index: {}]  }
   0x1   :  { %7 = vsyncpa [#allocation4], 0  ;;  %s13_s8 = sshll.u32 %s145_s0, 4  ;;  %s127_s9 = smov [#allocation2]   ;;  %s14_s8 = int_to_ptr.hbm [resolvable:$true] %s13_s8 }
   0x2   :  { %s15_s10 = sshll.u32 %s127_s9, 4  ;;  %s16_s10 = int_to_ptr.vmem [resolvable:$true] %s15_s10 }
   0x3   :  { %18 = dma.hbm_to_vmem [thread:$0]  %s14_s8, 96, %s16_s10, [#allocation3]  }
   0x4   :  { %123 = dma.done.wait [#allocation3], 96  }
   0x5   :  { %124 = vsyncadd [#allocation3], 4294967200  ;;  %v23_v0 = vlaneseq  ;;  %v29_v3 = vld [vmem:[#allocation2] ss:$2 sm:$0x7]  ;;  %s128_s0 = smov [#allocation5]  }
   0x6   :  { %v41_v4 = vld [vmem:[#allocation2 + $0x1] ss:$2 sm:$0x7]  ;;  %v31_v5 = vperm.slane %v29_v3, 0  ;;  %v32_v7 = vperm.slane %v29_v3, 1  ;;  %v33_v9 = vperm.slane %v29_v3, 2 }
   0x7   :  { %v24_v1 = vshrl.u32 %v23_v0, 7  ;;  %v43_v6 = vperm.slane %v41_v4, 0  ;;  %v44_v8 = vperm.slane %v41_v4, 1  ;;  %v45_v10 = vperm.slane %v41_v4, 2  ;;  %s61_s11 = sshll.u32 %s128_s0, 4  ;;  %s63_s14 = sshll.u32 %s146_s1, 4  ;;  %s62_s11 = int_to_ptr.vmem [resolvable:$true] %s61_s11  ;;  %s64_s14 = int_to_ptr.hbm [resolvable:$true] %s63_s14 }
   0x8   :  { %vm54_vm0 = vcmask 261120  }
   0x9   :  { %v28_v2 = vcvt.s32.f32 %v24_v1 }
   0xb   :  { %v37_v11 = vmul.f32 %v31_v5, %v28_v2  ;;  %v38_v12 = vmul.f32 %v32_v7, %v28_v2  ;;  %v39_v13 = vmul.f32 %v33_v9, %v28_v2 }
   0xd   :  { %v49_v14 = vadd.f32 %v43_v6, %v37_v11  ;;  %v50_v15 = vadd.f32 %v44_v8, %v38_v12  ;;  %v51_v16 = vadd.f32 %v45_v10, %v39_v13 }
   0xf   :  { %52 = vst [vmem:[#allocation5] sm:$0xff] %v49_v14 }
  0x10   :  { %53 = vst [vmem:[#allocation5 + $0x8] sm:$0xff] %v50_v15 }
  0x11   :  { %55 = vst.msk [vmem:[#allocation5 + $0x10] sm:$0xff] %vm54_vm0, %v51_v16 }
  0x12   :  { %66 = dma.vmem_to_hbm [thread:$0]  %s62_s11, 384, %s64_s14, [#allocation4]  }
  0x13   :  { %125 = dma.done.wait [#allocation4], 384  }
  0x14   :  { %126 = vsyncadd [#allocation4], 4294966912 }
  0x15   :  { %71 = vsyncpa [#allocation3], 1 }
  0x16   :  { %72 = vsyncpa [#allocation4], 1 }

</bundles_post_ra>
